<compile_context>
chip_gen: v5e
topology: v5e:2x2
jax: 0.10.0
libtpu: 0.0.40
codegen_flags: <defaults>
</compile_context>

<pallas_src>
import jax
import jax.numpy as jnp
from jax.experimental import pallas as pl
from jax.experimental.pallas import tpu as pltpu

IN_FEATURES = 4
OUT_FEATURES = 2

BATCH_TILE = 256          # batch rows per grid step when B is large
MAX_SINGLE_BLOCK = 256    # up to this many rows -> single block, no grid


def policy_kernel(x_ref, w_ref, b_ref, o_ref):
    # x_ref: (tb, 4), w_ref: (4, 2), b_ref: (1, 2), o_ref: (tb, 2)
    logits = jnp.dot(x_ref[...], w_ref[...],
                     preferred_element_type=jnp.float32) + b_ref[...]
    m = jnp.max(logits, axis=1, keepdims=True)
    e = jnp.exp(logits - m)
    s = jnp.sum(e, axis=1, keepdims=True)
    o_ref[...] = (e * pl.reciprocal(s, approx=False)).astype(o_ref.dtype)


def policy_forward(x, w, b):
    """x: (B, 4) f32, w: (4, 2) f32, b: (2,) f32 -> (B, 2) softmax probs."""
    B = x.shape[0]
    assert x.shape[1] == IN_FEATURES
    b2 = b.reshape(1, OUT_FEATURES)

    if B <= MAX_SINGLE_BLOCK:
        # Single full-array block; block_shape == array shape is legal even
        # when not (8,128)-aligned. No padding, no grid.
        return pl.pallas_call(
            policy_kernel,
            out_shape=jax.ShapeDtypeStruct((B, OUT_FEATURES), jnp.float32),
            in_specs=[
                pl.BlockSpec((B, IN_FEATURES), lambda: (0, 0)),
                pl.BlockSpec((IN_FEATURES, OUT_FEATURES), lambda: (0, 0)),
                pl.BlockSpec((1, OUT_FEATURES), lambda: (0, 0)),
            ],
            out_specs=pl.BlockSpec((B, OUT_FEATURES), lambda: (0, 0)),
        )(x, w, b2)

    # Large batch: tile the batch axis; pad B up to a multiple of BATCH_TILE
    # (padded rows produce a valid softmax of the bias and are sliced away).
    tb = BATCH_TILE
    b_pad = pl.cdiv(B, tb) * tb
    xp = x if b_pad == B else jnp.pad(x, ((0, b_pad - B), (0, 0)))
    out = pl.pallas_call(
        policy_kernel,
        out_shape=jax.ShapeDtypeStruct((b_pad, OUT_FEATURES), jnp.float32),
        grid=(b_pad // tb,),
        in_specs=[
            pl.BlockSpec((tb, IN_FEATURES), lambda i: (i, 0)),
            pl.BlockSpec((IN_FEATURES, OUT_FEATURES), lambda i: (0, 0)),
            pl.BlockSpec((1, OUT_FEATURES), lambda i: (0, 0)),
        ],
        out_specs=pl.BlockSpec((tb, OUT_FEATURES), lambda i: (i, 0)),
        compiler_params=pltpu.CompilerParams(
            dimension_semantics=("parallel",)),
    )(xp, w, b2)
    return out[:B]


if __name__ == "__main__":
    key = jax.random.PRNGKey(0)
    kx, kw, kb, kx2 = jax.random.split(key, 4)

    # Deterministic parameter init mimicking torch.nn.Linear's default:
    # U(-1/sqrt(in_features), 1/sqrt(in_features)); stored as (in, out) so the
    # kernel computes x @ W + b == torch's x @ W.T + b with W of shape (2, 4).
    bound = 1.0 / jnp.sqrt(jnp.float32(IN_FEATURES))
    w = jax.random.uniform(kw, (IN_FEATURES, OUT_FEATURES), jnp.float32,
                           minval=-bound, maxval=bound)
    b = jax.random.uniform(kb, (OUT_FEATURES,), jnp.float32,
                           minval=-bound, maxval=bound)

    # Small batch of 4-dim "states" (as the module's Linear(4, 2) implies).
    B = 2
    x = jax.random.normal(kx, (B, IN_FEATURES), jnp.float32)

    probs = policy_forward(x, w, b)
    probs = jax.block_until_ready(probs)

    ref = jax.nn.softmax(x @ w + b, axis=1)
    assert probs.shape == (B, OUT_FEATURES)
    assert jnp.allclose(probs, ref, atol=1e-5, rtol=1e-5), (probs, ref)
    assert jnp.allclose(jnp.sum(probs, axis=1), 1.0, atol=1e-5)

    # Also exercise the gridded large-batch path (vectorized rollout case).
    B2 = 300
    x2 = jax.random.normal(kx2, (B2, IN_FEATURES), jnp.float32)
    probs2 = jax.block_until_ready(policy_forward(x2, w, b))
    ref2 = jax.nn.softmax(x2 @ w + b, axis=1)
    assert probs2.shape == (B2, OUT_FEATURES)
    assert jnp.allclose(probs2, ref2, atol=1e-5, rtol=1e-5)

    print("KERNEL_OK")
</pallas_src>

<mosaic_0001>
module attributes {stable_mosaic.version = 11 : i64} {
  func.func @policy_kernel(%arg0: memref<2x4xf32, #tpu.memory_space<vmem>>, %arg1: memref<4x2xf32, #tpu.memory_space<vmem>>, %arg2: memref<1x2xf32, #tpu.memory_space<vmem>>, %arg3: memref<2x2xf32, #tpu.memory_space<vmem>>) attributes {dimension_semantics = [], scalar_prefetch = 0 : i64, scratch_operands = 0 : i64, tpu.core_type = #tpu.core_type<tc>} {
    %c0 = arith.constant 0 : index
    %c0_0 = arith.constant 0 : index
    %0 = vector.load %arg0[%c0, %c0_0] : memref<2x4xf32, #tpu.memory_space<vmem>>, vector<2x4xf32>
    %c0_1 = arith.constant 0 : index
    %c0_2 = arith.constant 0 : index
    %1 = vector.load %arg1[%c0_1, %c0_2] : memref<4x2xf32, #tpu.memory_space<vmem>>, vector<4x2xf32>
    %cst = arith.constant dense<0.000000e+00> : vector<2x2xf32>
    %2 = tpu.matmul %0, %1, %cst {dimension_numbers = #tpu.dot_dimension_numbers<[1], [0], [0], [1], [0, 0, 1, 1], [], []>} : vector<2x4xf32>, vector<4x2xf32>, vector<2x2xf32> -> vector<2x2xf32>
    %c0_3 = arith.constant 0 : index
    %c0_4 = arith.constant 0 : index
    %3 = vector.load %arg2[%c0_3, %c0_4] : memref<1x2xf32, #tpu.memory_space<vmem>>, vector<1x2xf32>
    %4 = vector.broadcast %3 : vector<1x2xf32> to vector<2x2xf32>
    %5 = arith.addf %2, %4 : vector<2x2xf32>
    %cst_5 = arith.constant dense<0xFF800000> : vector<2xf32>
    %6 = vector.multi_reduction <maximumf>, %5, %cst_5 [1] : vector<2x2xf32> to vector<2xf32>
    %7 = vector.shape_cast %6 : vector<2xf32> to vector<2x1xf32>
    %8 = vector.broadcast %7 : vector<2x1xf32> to vector<2x2xf32>
    %9 = arith.subf %5, %8 : vector<2x2xf32>
    %10 = math.exp %9 : vector<2x2xf32>
    %cst_6 = arith.constant dense<0.000000e+00> : vector<2xf32>
    %11 = vector.multi_reduction <add>, %10, %cst_6 [1] : vector<2x2xf32> to vector<2xf32>
    %12 = vector.shape_cast %11 : vector<2xf32> to vector<2x1xf32>
    %13 = tpu.reciprocal %12 : vector<2x1xf32> -> vector<2x1xf32>
    %14 = vector.broadcast %13 : vector<2x1xf32> to vector<2x2xf32>
    %15 = arith.mulf %10, %14 : vector<2x2xf32>
    %c0_7 = arith.constant 0 : index
    %c0_8 = arith.constant 0 : index
    %16 = vector.load %arg3[%c0_7, %c0_8] : memref<2x2xf32, #tpu.memory_space<vmem>>, vector<2x2xf32>
    tpu.vector_store %arg3[%c0_7, %c0_8], %15 {strides = array<i32>} : memref<2x2xf32, #tpu.memory_space<vmem>>, vector<2x2xf32>,
    return
  }
}

</mosaic_0001>

<bundles_post_ra>
// kernel: tpu_custom_call.1
= control target key start
LH: loop header
LB: loop body
LE: loop exit
PB: predicated region body
PF: predicated region fallthrough
CT: control target
= control target key end

     0   :  { %vm25_vm0 = vcmask 1043456   ;;  %vm21_vm1 = vcmask 31744   ;;  %s161_s0 = inlined_call_operand.vmem [shape: f32[2,4], index: 0, kind: input, shape index: {}]   ;;  %s162_s1 = inlined_call_operand.vmem [shape: f32[4,2], index: 1, kind: input, shape index: {}]   ;;  %s163_s2 = inlined_call_operand.vmem [shape: f32[1,2], index: 2, kind: input, shape index: {}]   ;;  %s164_s3 = inlined_call_operand.hbm [shape: f32[2,2], index: 3, kind: output, shape index: {}]  }
   0x1   :  { %v16_v0 = vld [vmem:[%s162_s1] sm:$0xf] }
   0x2   :  { %v15_v1 = vld [vmem:[%s161_s0] sm:$0x3]  ;;  %91 = vmatpush.msk.msra.mxu0 %vm25_vm0, %v16_v0 }
   0x3   :  { %8 = vsyncpa [#allocation3], 0  ;;  %92 = vmatmul.msk.f32.vlgmr.msra.gmra.mxu0 %vm21_vm1, %v15_v1  ;;  %v94_v2 = vld [vmem:[%s163_s2] ss:$0 sm:$0xff]  ;;  %vm49_vm2 = vcmask 9216   ;;  %s125_s0 = smov [#allocation2]  }
   0x4   :  { %s80_s1 = sshll.u32 %s125_s0, 4  ;;  %s82_s19 = sshll.u32 %s164_s3, 4  ;;  %s81_s1 = int_to_ptr.vmem [resolvable:$true] %s80_s1  ;;  %s83_s19 = int_to_ptr.hbm [resolvable:$true] %s82_s19 }
  0x80   :  { %v46_v3 = vpop.f32.mrf.mxu0 }
  0x81   :  { %v47_v4 = vadd.f32 %v94_v2, %v46_v3 }
  0x83   :  { %v50_v5 = vsel %vm49_vm2, %v47_v4, -inf }
  0x84   :  { %51 = vmax.xlane.f32.xlu0 %v50_v5 }
  0xf7   :  { %v52_v6 = vpop.xlane.xlu0 %51 }
  0xf8   :  { %v53_v7 = vsub.f32 %v47_v4, %v52_v6 }
  0xfa   :  { %v54_v8 = vmul.f32 1.442695, %v53_v7 }
  0xfc   :  { %95 = vpow2.f32 %v54_v8 }
 0x102   :  { %v96_v9 = vpop.eup %95 }
 0x103   :  { %v56_v10 = vsel %vm49_vm2, %v96_v9, 0.0 }
 0x104   :  { %57 = vadd.xlane.f32.xlu0 %v56_v10 }
 0x177   :  { %v58_v11 = vpop.xlane.xlu0 %57 }
 0x178   :  { %97 = vrcp.f32 %v58_v11  ;;  %v70_v15 = vand.u32 2147483648, %v58_v11  ;;  %v68_v17 = vand.u32 2147483647, %v58_v11  ;;  %vm64_vm4 = vweird.f32 %v58_v11 }
 0x17a   :  { %v71_v19 = vor.u32 1.1754944e-38, %v70_v15  ;;  %vm69_vm6 = vcmp.eq.f32.partialorder %v68_v17, 8.507059e+37 }
 0x17e   :  { %v98_v12 = vpop.eup %97 }
 0x17f   :  { %v60_v13 = vmul.f32 %v98_v12, %v58_v11  ;;  %vm65_vm3 = vweird.f32 %v98_v12 }
 0x180   :  { %vm66_vm5 = vmor %vm64_vm4, %vm65_vm3 }
 0x181   :  { %v61_v14 = vsub.f32 1.0, %v60_v13 }
 0x183   :  { %v62_v16 = vmul.f32 %v98_v12, %v61_v14 }
 0x185   :  { %v63_v18 = vadd.f32 %v98_v12, %v62_v16 }
 0x187   :  { %v67_v20 = vsel %vm66_vm5, %v98_v12, %v63_v18 }
 0x188   :  { %v72_v21 = vsel %vm69_vm6, %v71_v19, %v67_v20 }
 0x189   :  { %v73_v22 = vmul.f32 %v96_v9, %v72_v21 }
 0x18b   :  { %74 = vst.msk [vmem:[#allocation2] sm:$0x3] %vm49_vm2, %v73_v22 }
 0x18c   :  { %85 = dma.vmem_to_hbm [thread:$0]  %s81_s1, 32, %s83_s19, [#allocation3]  }
 0x18d   :  { %123 = dma.done.wait [#allocation3], 32  }
 0x18e   :  { %124 = vsyncadd [#allocation3], 4294967264 }
 0x18f   :  { %90 = vsyncpa [#allocation3], 1 }

</bundles_post_ra>
